<compile_context>
chip_gen: v6e
topology: v6e:2x2x1
jax: 0.10.0
libtpu: 0.0.40
codegen_flags: <defaults>
</compile_context>

<pallas_src>
import functools

import jax
import jax.numpy as jnp
from jax.experimental import pallas as pl
from jax.experimental.pallas import tpu as pltpu


def _attn_pool_kernel(mask_ref, x_ref, w_ref, b_ref, out_ref,
                      m_sc, l_sc, acc_sc, *, total_l, block_l, chunk_l):
    """Grid = (batch blocks, L blocks).

    mask_ref: (bn, 1, TL) f32   lane-dense mask block
    x_ref:    (bn, TL, D)       x block (input dtype)
    w_ref:    (1, D)            1x1-conv weight row (input dtype)
    b_ref:    (1,) f32          conv bias (SMEM)
    out_ref:  (bn, 1, D)        output block (written on the last L step)
    m_sc/l_sc:(bn, 1) f32       online-softmax running max / denominator
    acc_sc:   (bn, D) f32       running weighted sum
    """
    j = pl.program_id(1)

    @pl.when(j == 0)
    def _init():
        # finite init (not -inf) so rows whose early L blocks are fully masked
        # do not poison the online-softmax carry with NaNs.
        m_sc[...] = jnp.full_like(m_sc, jnp.finfo(jnp.float32).min)
        l_sc[...] = jnp.zeros_like(l_sc)
        acc_sc[...] = jnp.zeros_like(acc_sc)

    x = x_ref[...]                               # (bn, TL, D)
    m = mask_ref[...][:, 0, :]                   # (bn, TL) f32
    w = w_ref[...]                               # (1, D)

    ragged_l = (total_l % block_l) != 0
    if ragged_l:  # static: only traced when the last L block is ragged
        col = j * block_l + jax.lax.broadcasted_iota(jnp.int32, (1, block_l), 1)
        col_ok = col < total_l                   # (1, TL)
        m = jnp.where(col_ok, m, 0.0)            # out-of-range columns -> masked
        x = jnp.where(col_ok[:, :, None], x, 0)  # sanitize OOB garbage (avoid 0*inf)

    # MaskedConv1d(D->1, k=1): logits[n,l] = mask[n,l] * <x[n,l,:], w> + b
    # (VPU broadcast-multiply + lane reduce over D; f32 accumulation, no f32 tile copy)
    proj = jnp.sum(x * w, axis=-1, dtype=jnp.float32)          # (bn, TL)
    logits = m * proj + b_ref[0]
    logits = jnp.where(m != 0.0, logits, -jnp.inf)             # masked_fill(~mask, -inf)

    # online softmax update across L blocks
    m_prev = m_sc[...]                                         # (bn, 1)
    m_new = jnp.maximum(m_prev, jnp.max(logits, axis=-1, keepdims=True))
    alpha = jnp.exp(m_prev - m_new)                            # (bn, 1)
    p = jnp.exp(logits - m_new)                                # (bn, TL) f32
    m_sc[...] = m_new
    l_sc[...] = alpha * l_sc[...] + jnp.sum(p, axis=-1, keepdims=True)

    # weighted sum over this L block; chunked so no (bn, TL, D) f32 temp materializes,
    # attention weights stay in f32 (no bf16 round-trip).
    acc = acc_sc[...] * alpha                                  # (bn, D) f32
    for c in range(block_l // chunk_l):                        # static unroll
        s = c * chunk_l
        pc = p[:, s:s + chunk_l]                               # (bn, TC) f32
        xc = x[:, s:s + chunk_l, :]                            # (bn, TC, D)
        acc = acc + jnp.sum(pc[:, :, None] * xc, axis=1)       # f32 accumulate
    acc_sc[...] = acc
    # TODO(synk): on v6e/v7x, optionally offload this contraction to the idle MXU
    # via a batched lax.dot_general('bl,bld->bd') if a bundle dump shows VALU binding.

    @pl.when(j == pl.num_programs(1) - 1)
    def _finalize():
        # exact divide (tiny: bn*D elements once per batch block).
        # NOTE: a fully masked row yields 0/0 = NaN, matching the PyTorch module.
        res = acc_sc[...] / l_sc[...]                          # (bn, D) f32
        out_ref[...] = res[:, None, :].astype(out_ref.dtype)


def _choose_tiles(N, L, D, itemsize, target_bytes):
    row_bytes = D * itemsize
    # L tile: whole L when one batch row fits the budget (or L is too short to split
    # into 128-multiples); otherwise a multiple of 128 (lane rule of the mask block).
    if L * row_bytes <= target_bytes or L < 256:
        tl = L
    else:
        tl = (target_bytes // (row_bytes * 128)) * 128
        tl = int(min(max(tl, 128), (L // 128) * 128))
    # batch tile: fill the budget; multiple of 8 when possible.
    bn = max(1, target_bytes // (tl * row_bytes))
    if bn >= 8:
        bn = (bn // 8) * 8
    bn = int(min(bn, N))
    if bn >= N and N > 1:
        bn = (N + 1) // 2        # keep >= 2 steps on the parallel batch axis (megacore)
    bn = max(1, bn)
    # chunk size for the weighted-sum accumulation (bounds f32 temps, <= 16 chunks)
    tc = tl
    for cand in (8, 16, 32, 64, 128, 256):
        if tl % cand == 0 and tl // cand <= 16:
            tc = cand
            break
    return int(bn), int(tl), int(tc)


def _vmem_limit(bn, tl, tc, D, itemsize):
    xblk = bn * tl * D * itemsize                       # x block (double-buffered)
    f32_tmp = bn * tl * D * 4 + bn * tc * D * 4         # worst-case compiler temps
    mblk = bn * 8 * max(128, tl) * 4                    # sublane-padded mask block
    fixed = 4 << 20                                     # out block, scratch, w, slack
    return int(min(64 << 20, max(32 << 20, 2 * xblk + 2 * mblk + f32_tmp + fixed)))


def attention1d_pooling(x, weight, bias, input_mask=None, *, target_block_bytes=4 << 20):
    """x: (N, L, D); weight: (D, 1); bias: (1,); input_mask: (N, L, 1)/(N, L) or None."""
    N, L, D = x.shape
    if input_mask is None:
        mask = jnp.ones((N, 1, L), dtype=jnp.float32)
    else:
        mask = input_mask.reshape(N, 1, L).astype(jnp.float32)
    w = weight.reshape(1, D).astype(x.dtype)       # 1x1-conv weight as a lane-dense row
    b = bias.reshape(1).astype(jnp.float32)        # scalar bias -> SMEM

    bn, tl, tc = _choose_tiles(N, L, D, x.dtype.itemsize, target_block_bytes)
    nb, nl = pl.cdiv(N, bn), pl.cdiv(L, tl)

    kernel = functools.partial(_attn_pool_kernel, total_l=L, block_l=tl, chunk_l=tc)
    out = pl.pallas_call(
        kernel,
        out_shape=jax.ShapeDtypeStruct((N, 1, D), x.dtype),
        grid_spec=pltpu.PrefetchScalarGridSpec(
            num_scalar_prefetch=0,
            grid=(nb, nl),
            in_specs=[
                pl.BlockSpec((bn, 1, tl), lambda i, j: (i, 0, j)),   # mask
                pl.BlockSpec((bn, tl, D), lambda i, j: (i, j, 0)),   # x
                pl.BlockSpec((1, D), lambda i, j: (0, 0)),           # weight row
                pl.BlockSpec(memory_space=pltpu.MemorySpace.SMEM),   # bias
            ],
            out_specs=pl.BlockSpec((bn, 1, D), lambda i, j: (i, 0, 0)),
            scratch_shapes=[
                pltpu.VMEM((bn, 1), jnp.float32),   # running max
                pltpu.VMEM((bn, 1), jnp.float32),   # running denominator
                pltpu.VMEM((bn, D), jnp.float32),   # running weighted sum
            ],
        ),
        compiler_params=pltpu.CompilerParams(
            dimension_semantics=("parallel", "arbitrary"),
            vmem_limit_bytes=_vmem_limit(bn, tl, tc, D, x.dtype.itemsize),
        ),
    )(mask, x, w, b)
    return out.reshape(N, D)


def _reference(x, weight, bias, input_mask=None):
    N, L, D = x.shape
    w = weight.reshape(D)
    if input_mask is not None:
        xm = x * input_mask.reshape(N, L, 1).astype(x.dtype)
    else:
        xm = x
    logits = jnp.einsum("nld,d->nl", xm, w) + bias[0]
    if input_mask is not None:
        logits = jnp.where(input_mask.reshape(N, L) != 0, logits, -jnp.inf)
    attn = jax.nn.softmax(logits, axis=-1)
    return jnp.einsum("nl,nld->nd", attn, x)


if __name__ == "__main__":
    key = jax.random.PRNGKey(0)
    k1, k2, k3, k4, k5 = jax.random.split(key, 5)

    # Module-scale small shapes: batch=2, seq=16, encoder_embed_dim=32
    N, L, D = 2, 16, 32
    x = jax.random.normal(k1, (N, L, D), dtype=jnp.float32)
    weight = jax.random.normal(k2, (D, 1), dtype=jnp.float32) * 0.1   # Conv1d(D,1,1) weight
    bias = jax.random.normal(k3, (1,), dtype=jnp.float32) * 0.1

    # 1) masked
    valid = jnp.array([12, 16])
    mask1 = (jnp.arange(L)[None, :] < valid[:, None]).astype(jnp.float32)[..., None]
    out = attention1d_pooling(x, weight, bias, mask1)
    jax.block_until_ready(out)
    ref = _reference(x, weight, bias, mask1)
    err = float(jnp.max(jnp.abs(out - ref)))
    assert jnp.allclose(out, ref, atol=1e-3, rtol=1e-3), f"masked case mismatch, max|diff|={err}"

    # 2) no mask, N=3 (exercises the ragged last batch block, no wrapper-side padding)
    x2 = jax.random.normal(k4, (3, L, D), dtype=jnp.float32)
    out2 = attention1d_pooling(x2, weight, bias, None)
    jax.block_until_ready(out2)
    ref2 = _reference(x2, weight, bias, None)
    err2 = float(jnp.max(jnp.abs(out2 - ref2)))
    assert jnp.allclose(out2, ref2, atol=1e-3, rtol=1e-3), f"no-mask case mismatch, max|diff|={err2}"

    # 3) longer L with a small block budget: exercises L-blocking (online softmax),
    #    the ragged L tail, and a fully-masked L block for one row.
    N3, L3, D3 = 3, 320, 64
    x3 = jax.random.normal(k5, (N3, L3, D3), dtype=jnp.float32)
    w3 = jax.random.normal(k2, (D3, 1), dtype=jnp.float32) * 0.1
    pos = jnp.arange(L3)
    mask3 = jnp.stack([pos < 300, pos < 40, pos >= 280]).astype(jnp.float32)[..., None]
    out3 = attention1d_pooling(x3, w3, bias, mask3, target_block_bytes=64 << 10)
    jax.block_until_ready(out3)
    ref3 = _reference(x3, w3, bias, mask3)
    err3 = float(jnp.max(jnp.abs(out3 - ref3)))
    assert jnp.allclose(out3, ref3, atol=1e-3, rtol=1e-3), f"L-blocked case mismatch, max|diff|={err3}"

    print("KERNEL_OK")
</pallas_src>

<mosaic_0001>
module attributes {stable_mosaic.version = 11 : i64} {
  func.func @_attn_pool_kernel(%arg0: i32, %arg1: i32, %arg2: memref<1x1x16xf32, #tpu.memory_space<vmem>>, %arg3: memref<1x16x32xf32, #tpu.memory_space<vmem>>, %arg4: memref<1x32xf32, #tpu.memory_space<vmem>>, %arg5: memref<1xf32, #tpu.memory_space<smem>>, %arg6: memref<1x1x32xf32, #tpu.memory_space<vmem>>, %arg7: memref<1x1xf32, #tpu.memory_space<vmem>>, %arg8: memref<1x1xf32, #tpu.memory_space<vmem>>, %arg9: memref<1x32xf32, #tpu.memory_space<vmem>>) attributes {dimension_semantics = [#tpu.dimension_semantics<parallel>, #tpu.dimension_semantics<arbitrary>], iteration_bounds = array<i64: 2, 1>, scalar_prefetch = 0 : i64, scratch_operands = 3 : i64, tpu.core_type = #tpu.core_type<tc>, window_params = [{transform_indices = @transform_0, window_bounds = array<i64: 1, 1, 16>}, {transform_indices = @transform_1, window_bounds = array<i64: 1, 16, 32>}, {pipeline_mode = #tpu.pipeline_mode<synchronous>, transform_indices = @transform_2, window_bounds = array<i64: 1, 32>}, {transform_indices = @transform_3, window_bounds = array<i64: 1>}, {transform_indices = @transform_4, window_bounds = array<i64: 1, 1, 32>}]} {
    %c0_i32 = arith.constant 0 : i32
    %0 = arith.cmpi eq, %arg1, %c0_i32 : i32
    %1 = arith.extui %0 : i1 to i32
    %c0_i32_0 = arith.constant 0 : i32
    %2 = arith.cmpi ne, %1, %c0_i32_0 : i32
    scf.if %2 {
      %cst_29 = arith.constant -3.40282347E+38 : f32
      %56 = vector.broadcast %cst_29 : f32 to vector<1x1xf32>
      %c0_30 = arith.constant 0 : index
      %c0_31 = arith.constant 0 : index
      %57 = vector.load %arg7[%c0_30, %c0_31] : memref<1x1xf32, #tpu.memory_space<vmem>>, vector<1x1xf32>
      tpu.vector_store %arg7[%c0_30, %c0_31], %56 {strides = array<i32>} : memref<1x1xf32, #tpu.memory_space<vmem>>, vector<1x1xf32>,
      %cst_32 = arith.constant 0.000000e+00 : f32
      %58 = vector.broadcast %cst_32 : f32 to vector<1x1xf32>
      %c0_33 = arith.constant 0 : index
      %c0_34 = arith.constant 0 : index
      %59 = vector.load %arg8[%c0_33, %c0_34] : memref<1x1xf32, #tpu.memory_space<vmem>>, vector<1x1xf32>
      tpu.vector_store %arg8[%c0_33, %c0_34], %58 {strides = array<i32>} : memref<1x1xf32, #tpu.memory_space<vmem>>, vector<1x1xf32>,
      %cst_35 = arith.constant 0.000000e+00 : f32
      %60 = vector.broadcast %cst_35 : f32 to vector<1x32xf32>
      %c0_36 = arith.constant 0 : index
      %c0_37 = arith.constant 0 : index
      %61 = vector.load %arg9[%c0_36, %c0_37] : memref<1x32xf32, #tpu.memory_space<vmem>>, vector<1x32xf32>
      tpu.vector_store %arg9[%c0_36, %c0_37], %60 {strides = array<i32>} : memref<1x32xf32, #tpu.memory_space<vmem>>, vector<1x32xf32>,
    } else {
    }
    %c0 = arith.constant 0 : index
    %c0_1 = arith.constant 0 : index
    %c0_2 = arith.constant 0 : index
    %3 = vector.load %arg3[%c0, %c0_1, %c0_2] : memref<1x16x32xf32, #tpu.memory_space<vmem>>, vector<1x16x32xf32>
    %c0_3 = arith.constant 0 : index
    %c0_4 = arith.constant 0 : index
    %c0_5 = arith.constant 0 : index
    %4 = vector.load %arg2[%c0_3, %c0_4, %c0_5] : memref<1x1x16xf32, #tpu.memory_space<vmem>>, vector<1x1x16xf32>
    %5 = vector.shape_cast %4 : vector<1x1x16xf32> to vector<1x16xf32>
    %c0_6 = arith.constant 0 : index
    %c0_7 = arith.constant 0 : index
    %6 = vector.load %arg4[%c0_6, %c0_7] : memref<1x32xf32, #tpu.memory_space<vmem>>, vector<1x32xf32>
    %7 = vector.shape_cast %6 : vector<1x32xf32> to vector<1x1x32xf32>
    %8 = vector.broadcast %7 : vector<1x1x32xf32> to vector<1x16x32xf32>
    %9 = arith.mulf %3, %8 : vector<1x16x32xf32>
    %cst = arith.constant dense<0.000000e+00> : vector<1x16xf32>
    %10 = vector.multi_reduction <add>, %9, %cst [2] : vector<1x16x32xf32> to vector<1x16xf32>
    %11 = arith.mulf %5, %10 : vector<1x16xf32>
    %c0_8 = arith.constant 0 : index
    %12 = memref.load %arg5[%c0_8] : memref<1xf32, #tpu.memory_space<smem>>
    %13 = vector.broadcast %12 : f32 to vector<1x16xf32>
    %14 = arith.addf %11, %13 : vector<1x16xf32>
    %cst_9 = arith.constant 0.000000e+00 : f32
    %15 = vector.broadcast %cst_9 : f32 to vector<1x16xf32>
    %16 = arith.cmpf one, %5, %15 : vector<1x16xf32>
    %cst_10 = arith.constant 0xFF800000 : f32
    %17 = vector.broadcast %cst_10 : f32 to vector<1x16xf32>
    %18 = arith.select %16, %14, %17 : vector<1x16xi1>, vector<1x16xf32>
    %c0_11 = arith.constant 0 : index
    %c0_12 = arith.constant 0 : index
    %19 = vector.load %arg7[%c0_11, %c0_12] : memref<1x1xf32, #tpu.memory_space<vmem>>, vector<1x1xf32>
    %cst_13 = arith.constant dense<0xFF800000> : vector<1xf32>
    %20 = vector.multi_reduction <maximumf>, %18, %cst_13 [1] : vector<1x16xf32> to vector<1xf32>
    %21 = vector.shape_cast %20 : vector<1xf32> to vector<1x1xf32>
    %22 = arith.maximumf %19, %21 : vector<1x1xf32>
    %23 = arith.subf %19, %22 : vector<1x1xf32>
    %24 = math.exp %23 : vector<1x1xf32>
    %25 = vector.broadcast %22 : vector<1x1xf32> to vector<1x16xf32>
    %26 = arith.subf %18, %25 : vector<1x16xf32>
    %27 = math.exp %26 : vector<1x16xf32>
    %c0_14 = arith.constant 0 : index
    %c0_15 = arith.constant 0 : index
    %28 = vector.load %arg7[%c0_14, %c0_15] : memref<1x1xf32, #tpu.memory_space<vmem>>, vector<1x1xf32>
    tpu.vector_store %arg7[%c0_14, %c0_15], %22 {strides = array<i32>} : memref<1x1xf32, #tpu.memory_space<vmem>>, vector<1x1xf32>,
    %c0_16 = arith.constant 0 : index
    %c0_17 = arith.constant 0 : index
    %29 = vector.load %arg8[%c0_16, %c0_17] : memref<1x1xf32, #tpu.memory_space<vmem>>, vector<1x1xf32>
    %30 = arith.mulf %24, %29 : vector<1x1xf32>
    %cst_18 = arith.constant dense<0.000000e+00> : vector<1xf32>
    %31 = vector.multi_reduction <add>, %27, %cst_18 [1] : vector<1x16xf32> to vector<1xf32>
    %32 = vector.shape_cast %31 : vector<1xf32> to vector<1x1xf32>
    %33 = arith.addf %30, %32 : vector<1x1xf32>
    %c0_19 = arith.constant 0 : index
    %c0_20 = arith.constant 0 : index
    %34 = vector.load %arg8[%c0_19, %c0_20] : memref<1x1xf32, #tpu.memory_space<vmem>>, vector<1x1xf32>
    tpu.vector_store %arg8[%c0_19, %c0_20], %33 {strides = array<i32>} : memref<1x1xf32, #tpu.memory_space<vmem>>, vector<1x1xf32>,
    %c0_21 = arith.constant 0 : index
    %c0_22 = arith.constant 0 : index
    %35 = vector.load %arg9[%c0_21, %c0_22] : memref<1x32xf32, #tpu.memory_space<vmem>>, vector<1x32xf32>
    %36 = vector.broadcast %24 : vector<1x1xf32> to vector<1x32xf32>
    %37 = arith.mulf %35, %36 : vector<1x32xf32>
    %38 = vector.extract_strided_slice %27 {offsets = [0, 0], sizes = [1, 8], strides = [1, 1]} : vector<1x16xf32> to vector<1x8xf32>
    %39 = vector.extract_strided_slice %3 {offsets = [0, 0, 0], sizes = [1, 8, 32], strides = [1, 1, 1]} : vector<1x16x32xf32> to vector<1x8x32xf32>
    %40 = vector.shape_cast %38 : vector<1x8xf32> to vector<1x8x1xf32>
    %41 = vector.broadcast %40 : vector<1x8x1xf32> to vector<1x8x32xf32>
    %42 = arith.mulf %41, %39 : vector<1x8x32xf32>
    %cst_23 = arith.constant dense<0.000000e+00> : vector<1x32xf32>
    %43 = vector.multi_reduction <add>, %42, %cst_23 [1] : vector<1x8x32xf32> to vector<1x32xf32>
    %44 = arith.addf %37, %43 : vector<1x32xf32>
    %45 = vector.extract_strided_slice %27 {offsets = [0, 8], sizes = [1, 8], strides = [1, 1]} : vector<1x16xf32> to vector<1x8xf32>
    %46 = vector.extract_strided_slice %3 {offsets = [0, 8, 0], sizes = [1, 8, 32], strides = [1, 1, 1]} : vector<1x16x32xf32> to vector<1x8x32xf32>
    %47 = vector.shape_cast %45 : vector<1x8xf32> to vector<1x8x1xf32>
    %48 = vector.broadcast %47 : vector<1x8x1xf32> to vector<1x8x32xf32>
    %49 = arith.mulf %48, %46 : vector<1x8x32xf32>
    %cst_24 = arith.constant dense<0.000000e+00> : vector<1x32xf32>
    %50 = vector.multi_reduction <add>, %49, %cst_24 [1] : vector<1x8x32xf32> to vector<1x32xf32>
    %51 = arith.addf %44, %50 : vector<1x32xf32>
    %c0_25 = arith.constant 0 : index
    %c0_26 = arith.constant 0 : index
    %52 = vector.load %arg9[%c0_25, %c0_26] : memref<1x32xf32, #tpu.memory_space<vmem>>, vector<1x32xf32>
    tpu.vector_store %arg9[%c0_25, %c0_26], %51 {strides = array<i32>} : memref<1x32xf32, #tpu.memory_space<vmem>>, vector<1x32xf32>,
    %c0_i32_27 = arith.constant 0 : i32
    %53 = arith.cmpi eq, %arg1, %c0_i32_27 : i32
    %54 = arith.extui %53 : i1 to i32
    %c0_i32_28 = arith.constant 0 : i32
    %55 = arith.cmpi ne, %54, %c0_i32_28 : i32
    scf.if %55 {
      %c0_29 = arith.constant 0 : index
      %c0_30 = arith.constant 0 : index
      %56 = vector.load %arg9[%c0_29, %c0_30] : memref<1x32xf32, #tpu.memory_space<vmem>>, vector<1x32xf32>
      %c0_31 = arith.constant 0 : index
      %c0_32 = arith.constant 0 : index
      %57 = vector.load %arg8[%c0_31, %c0_32] : memref<1x1xf32, #tpu.memory_space<vmem>>, vector<1x1xf32>
      %58 = vector.broadcast %57 : vector<1x1xf32> to vector<1x32xf32>
      %59 = arith.divf %56, %58 : vector<1x32xf32>
      %60 = vector.shape_cast %59 : vector<1x32xf32> to vector<1x1x32xf32>
      %c0_33 = arith.constant 0 : index
      %c0_34 = arith.constant 0 : index
      %c0_35 = arith.constant 0 : index
      %61 = vector.load %arg6[%c0_33, %c0_34, %c0_35] : memref<1x1x32xf32, #tpu.memory_space<vmem>>, vector<1x1x32xf32>
      tpu.vector_store %arg6[%c0_33, %c0_34, %c0_35], %60 {strides = array<i32>} : memref<1x1x32xf32, #tpu.memory_space<vmem>>, vector<1x1x32xf32>,
    } else {
    }
    return
  }
  func.func @transform_0(%arg0: i32, %arg1: i32) -> (i32, i32, i32) {
    %c0_i32 = arith.constant 0 : i32
    %c0_i32_0 = arith.constant 0 : i32
    return %arg0, %c0_i32, %arg1 : i32, i32, i32
  }
  func.func @transform_1(%arg0: i32, %arg1: i32) -> (i32, i32, i32) {
    %c0_i32 = arith.constant 0 : i32
    %c0_i32_0 = arith.constant 0 : i32
    return %arg0, %arg1, %c0_i32 : i32, i32, i32
  }
  func.func @transform_2(%arg0: i32, %arg1: i32) -> (i32, i32) {
    %c0_i32 = arith.constant 0 : i32
    %c0_i32_0 = arith.constant 0 : i32
    %c0_i32_1 = arith.constant 0 : i32
    return %c0_i32, %c0_i32_0 : i32, i32
  }
  func.func @transform_3(%arg0: i32, %arg1: i32) -> i32 {
    %c0_i32 = arith.constant 0 : i32
    %c0_i32_0 = arith.constant 0 : i32
    return %c0_i32 : i32
  }
  func.func @transform_4(%arg0: i32, %arg1: i32) -> (i32, i32, i32) {
    %c0_i32 = arith.constant 0 : i32
    %c0_i32_0 = arith.constant 0 : i32
    %c0_i32_1 = arith.constant 0 : i32
    return %arg0, %c0_i32, %c0_i32_0 : i32, i32, i32
  }
}

</mosaic_0001>

<bundles_post_ra>
// kernel: tpu_custom_call.1
= control target key start
LH: loop header
LB: loop body
LE: loop exit
PB: predicated region body
PF: predicated region fallthrough
CT: control target
= control target key end

     0   :  { %s1118_s0 = inlined_call_operand.vmem [shape: f32[2,1,16], index: 0, kind: input, shape index: {}]   ;;  %s1119_s1 = inlined_call_operand.hbm [shape: f32[2,16,32], index: 1, kind: input, shape index: {}]   ;;  %s1120_s2 = inlined_call_operand.vmem [shape: f32[1,32], index: 2, kind: input, shape index: {}]   ;;  %s1121_s3 = inlined_call_operand.<no memory space> [shape: f32[1], index: 3, kind: input, shape index: {}]   ;;  %s1122_s4 = inlined_call_operand.hbm [shape: f32[2,1,32], index: 4, kind: output, shape index: {}]  }
   0x1   :  { %9 = sst [smem:[#allocation5]] %s1121_s3 }
   0x2   :  { %10 = vsyncpa [#allocation7], 0 }
   0x3   :  { %12 = vsyncpa [#allocation7 + $0x1], 0 }
   0x4   :  { %13 = vsyncpa [#allocation8], 0 }
   0x5   :  { %15 = vsyncpa [#allocation8 + $0x1], 0  ;;  %s917_s17 = smov 0   ;;  %s919_s18 = smov 0  }
   0x6   :  { %s921_s19 = smov 0   ;;  %s923_s20 = smov 0  }
   0x7   :  { %s925_s21 = smov 0   ;;  %s927_s22 = smov 0  }
   0x8 LB: > { %s681_s3 = sadd.s32 4294967295, %s879_s22   ;;  %s682_s23 = sadd.s32 4294967294, %s879_s22   ;;  %s879_s22 = sphi %s927_s22, %s21_s22   ;;  %s875_s21 = sphi %s925_s21, %s1133_s21   ;;  %s871_s20 = sphi %s923_s20, %s1132_s20   ;;  %s867_s19 = sphi %s921_s19, %s1131_s19   ;;  %s863_s18 = sphi %s919_s18, %s1130_s18   ;;  %s859_s17 = sphi %s917_s17, %s1129_s17  }
   0x9   : > { %s33_s24 = sadd.s32 1, %s875_s21  ;;  %s70_s25 = sadd.s32 1, %s867_s19 }
   0xa   : > { %p35_p0 = scmp.ge.s32.totalorder %s33_s24, 2  ;;  %p77_p1 = scmp.ne.s32.totalorder %s867_s19, %s863_s18 }
   0xb   : > { %p78_p2 = scmp.eq.s32.totalorder %s879_s22, 0  ;;  %p83_p3 = scmp.ne.s32.totalorder %s863_s18, %s859_s17 }
   0xc   : > { %s1135_s24 = smov (%p35_p0, %s33_s24), 0  ;;  %p84_p5 = scmp.eq.s32.totalorder %s681_s3, 0 }
   0xd   : > { %p958_p4 = por %p78_p2, %p77_p1  ;;  %s65_s27 = ssub.s32 %s875_s21, %s1135_s24 }
   0xe   : > { %p149_p6 = scmp.eq.s32.totalorder %s681_s3, 1  ;;  %p68_p7 = scmp.eq.s32.totalorder %s65_s27, 0 }
   0xf   : > { %p964_p8 = por %p84_p5, %p83_p3  ;;  %p155_p10 = scmp.eq.s32.totalorder %s682_s23, 1 }
  0x10   : > { %p968_p9 = por %p149_p6, %p77_p1  ;;  %p707_p13 = scmp.lt.s32.totalorder %s879_s22, 2 }
  0x11   : > { %s973_s30 = scalar_select %p68_p7, %s867_s19, %s70_s25  }
  0x12   : > { %p975_p11 = por %p155_p10, %p83_p3  ;;  %s190_s6 = sand.u32 1, %s867_s19  }
  0x13   : > { %s685_s7 = sshll.u32 %s190_s6, 4  ;;  %s694_s8 = sshll.u32 %s875_s21, 8 }
  0x14   : > { %s202_s11 = scalar_lea.hbm %s1119_s1, %s694_s8  ;;  %s194_s12 = scalar_lea.vmem [#allocation6], %s685_s7 }
  0x15   : > { %s203_s13 = sshll.u32 %s194_s12, 4  ;;  %p988_p0 = pnand %p707_p13, %p958_p4  ;;  %s204_s13 = int_to_ptr.vmem [resolvable:$true] %s203_s13 }
  0x16   : > { %p688_p1 = scmp.ge.s32.totalorder %s879_s22, 1  ;;  %s191_s15 = scalar_lea.sflag [#allocation7], %s190_s6 }
  0x17   : > { %p773_p2 = pneg %p988_p0  ;;  %s784_s16 = scalar_lea.vmem %s204_s13, 256 }
  0x18   : > { %p785_p3 = scmp.ne.s32.totalorder %s204_s13, %s784_s16  ;;  %s881_s3 = smov [#allocation6]  }
  0x19   : > { %s789_s23 = sshll.u32 %s881_s3, 4  ;;  %s790_s23 = int_to_ptr.vmem [resolvable:$false] %s789_s23 }
  0x1a   : > { %p787_p5 = pnand %p785_p3, %p773_p2  ;;  %s791_s25 = scalar_lea.vmem %s790_s23, 512 }
  0x1b   : > { %p792_p7 = scmp.lt.s32.totalorder %s204_s13, %s790_s23  ;;  %p793_p10 = scmp.lt.s32.totalorder %s791_s25, %s784_s16 }
  0x1c   : > { %p788_p6 = pneg %p787_p5 }
  0x1d   : > { %p794_p12 = por %p793_p10, %p792_p7 }
  0x1f   : > { %p795_p4 = pnand %p794_p12, %p788_p6 }
  0x21   : > { %798 = shalt.err (!%p795_p4)
}
  0x22   : > { %s882_s26 = smov 128   ;;  %s883_s27 = smov 8  }
  0x23   : > { %702 = dma.hbm_to_vmem [thread:$0]  (!%p988_p0), %s202_s11, 256, %s204_s13, %s191_s15, %s882_s26, %s882_s26, %s883_s27  }
  0x24   : > { %p211_p13 = scmp.lt.s32.totalorder %s879_s22, 3 }
  0x26   : > { %p212_p2 = pnand %p688_p1, %p211_p13 }
  0x27   : > { %s1001_s6 = sand.u32 (!%p212_p2), 1, %s863_s18  }
  0x28   : > { %215 = sbr.rel (%p212_p2) target bundleno = 932 (0x3a4), region = 36  ;;  %s689_s7 = sshll.u32 (!%p212_p2), %s1001_s6, 4 }
  0x29   : > { %s218_s8 = scalar_lea.sflag (!%p212_p2), [#allocation7], %s1001_s6  ;;  %s221_s9 = scalar_lea.vmem (!%p212_p2), [#allocation6], %s689_s7 }
  0x2d   : > { %850 = dma.done.wait (%p964_p8), %s218_s8, 256  }
  0x2e   : > { %852 = vsyncadd (%p964_p8), %s218_s8, 4294967040  ;;  %v1009_v0 = vld [vmem:[%s221_s9] sm:$0xff]  ;;  %v690_v1 = vld [vmem:[%s1120_s2] ss:$0 sm:$0xff]  ;;  %vm279_vm0 = vcmask 261120   ;;  %v884_v7 = vmov 0   ;;  %v288_v8 = vlaneseq }
  0x2f   : > { %v1014_v2 = vld [vmem:[%s221_s9 + $0x8] sm:$0xff]  ;;  %v277_v3 = vmul.f32 %v690_v1, %v1009_v0  ;;  %763 = vset.pattern.permute.xlu1 %v884_v7  ;;  %764 = vset.pattern.permute.xlu0 %v884_v7  ;;  %v885_v9 = vmov 1966171168   ;;  %vm262_vm1 = vcmask 0   ;;  %p251_p8 = scmp.lt.s32.totalorder %s871_s20, 1  ;;  %s485_s12 = sld [smem:[#allocation5]] }
  0x30   : > { %v278_v4 = vmul.f32 %v690_v1, %v1014_v2  ;;  %v357_v10 = vunpack.c.l.s4 %v885_v9  ;;  %v1021_v11 = vshrl.u32 %v288_v8, 7  ;;  %vm467_vm2 = vcmask 130112   ;;  %s691_s16 = sshll.u32 %s871_s20, 4  ;;  %s250_s3 = scalar_lea.vmem [#allocation9], %s1001_s6 }
  0x31   : > { %v280_v5 = vsel %vm279_vm0, %v277_v3, 0.0  ;;  %s252_s28 = scalar_select %p251_p8, %s871_s20, 1  ;;  %vm491_vm4 = vcmask 122880   ;;  %vm265_vm5 = vcmask 253952  }
  0x32   : > { %281 = vadd.xlane.f32.xlu0 %v280_v5  ;;  %v283_v6 = vsel %vm279_vm0, %v278_v4, 0.0  ;;  %v358_v12 = vunpack.c.0.s8 %v357_v10  ;;  %v1024_v13 = vsub.s32 0, %v1021_v11  ;;  %v294_v14 = vsub.s32 1, %v1021_v11  ;;  %s592_s23 = sshll.u32 %s250_s3, 4  ;;  %s590_s27 = scalar_lea.hbm %s1122_s4, %s691_s16  ;;  %s593_s23 = int_to_ptr.vmem [resolvable:$true] %s592_s23 }
  0x33   : > { %v298_v15 = vsub.s32 2, %v1021_v11  ;;  %v302_v16 = vsub.s32 3, %v1021_v11  ;;  %v306_v17 = vsub.s32 4, %v1021_v11  ;;  %v310_v18 = vsub.s32 5, %v1021_v11  ;;  %s256_s15 = scalar_lea.vmem %s1118_s0, %s252_s28  ;;  %s580_s7 = scalar_lea.sflag [#allocation8], %s1001_s6 }
  0x34   : > { %v314_v19 = vsub.s32 6, %v1021_v11  ;;  %v318_v20 = vsub.s32 7, %v1021_v11  ;;  %v1034_v22 = vsub.s32 %v358_v12, %v1021_v11  ;;  %v886_v4 = vmov -3.4028235e+38   ;;  %s799_s8 = scalar_lea.vmem %s593_s23, 16  ;;  %s888_s9 = smov [#allocation9]  }
  0x35   : > { %263 = vst.msk [vmem:[#allocation2] sm:$0x1] %vm262_vm1, %v886_v4  ;;  %v457_v5 = vand.u32 127, %v288_v8  ;;  %p800_p12 = scmp.ne.s32.totalorder %s593_s23, %s799_s8  ;;  %s803_s20 = sshll.u32 %s888_s9, 4  ;;  %s804_s20 = int_to_ptr.vmem [resolvable:$false] %s803_s20 }
  0x36   : > { %284 = vadd.xlane.f32.xlu0 %v283_v6  ;;  %s805_s10 = scalar_lea.vmem %s804_s20, 32  ;;  %p806_p3 = scmp.lt.s32.totalorder %s593_s23, %s804_s20 }
  0x37   : > { %v462_v6 = vadd.s32 4294967288, %v457_v5  ;;  %v460_v9 = vsub.s32 %v457_v5, %v1021_v11  ;;  %p801_p0 = pnand %p800_p12, %p968_p9  ;;  %p807_p5 = scmp.lt.s32.totalorder %s805_s10, %s799_s8 }
  0x39   : > { %v465_v10 = vsub.s32 %v462_v6, %v1021_v11  ;;  %p802_p1 = pneg %p801_p0  ;;  %p808_p6 = por %p807_p5, %p806_p3 }
  0x3b   : > { %p809_p7 = pnand %p808_p6, %p802_p1 }
  0xbb   : > { %v282_v21 = vpop.xlane.xlu0 %281 }
  0xbc   : > { %v291_v23 = vrot.slane %v282_v21, %v1024_v13  ;;  %v295_v24 = vrot.slane %v282_v21, %v294_v14  ;;  %v299_v25 = vrot.slane %v282_v21, %v298_v15  ;;  %v303_v26 = vrot.slane %v282_v21, %v302_v16 }
  0xbd   : > { %v307_v27 = vrot.slane %v282_v21, %v306_v17  ;;  %v311_v28 = vrot.slane %v282_v21, %v310_v18  ;;  %v315_v29 = vrot.slane %v282_v21, %v314_v19  ;;  %v319_v30 = vrot.slane %v282_v21, %v318_v20 }
  0xbe   : > { %v352_v31 = vcombine.low %v291_v23, %v295_v24  ;;  %v353_v32 = vcombine.low %v299_v25, %v303_v26  ;;  %v887_v24 = vmov 0.0   ;;  %v490_v25 = vld [vmem:[#allocation2] sm:$0x1] }
  0xbf   : > { %v285_v33 = vpop.xlane.xlu0 %284  ;;  %v354_v34 = vcombine.low %v307_v27, %v311_v28  ;;  %v355_v35 = vcombine.low %v315_v29, %v319_v30  ;;  %264 = vst.msk [vmem:[#allocation3] sm:$0x1] %vm262_vm1, %v887_v24 }
  0xc0   : > { %v362_v36 = vrot.slane %v352_v31, %v1034_v22  ;;  %v369_v37 = vrot.slane %v353_v32, %v1034_v22  ;;  %v323_v38 = vrot.slane %v285_v33, %v1024_v13  ;;  %v327_v39 = vrot.slane %v285_v33, %v294_v14  ;;  %266 = vst.msk [vmem:[#allocation4] sm:$0x1] %vm265_vm5, %v887_v24 }
  0xc1   : > { %v376_v40 = vrot.slane %v354_v34, %v1034_v22  ;;  %v383_v41 = vrot.slane %v355_v35, %v1034_v22  ;;  %v331_v42 = vrot.slane %v285_v33, %v298_v15  ;;  %v335_v43 = vrot.slane %v285_v33, %v302_v16 }
  0xc2   : > { %v384_v44 = vcombine.low %v362_v36, %v369_v37  ;;  %v339_v45 = vrot.slane %v285_v33, %v306_v17  ;;  %v343_v46 = vrot.slane %v285_v33, %v310_v18  ;;  %v347_v47 = vrot.slane %v285_v33, %v314_v19  ;;  %v269_v17 = vld [vmem:[%s256_s15] sm:$0x1] }
  0xc3   : > { %v385_v48 = vcombine.low %v376_v40, %v383_v41  ;;  %v351_v49 = vrot.slane %v285_v33, %v318_v20  ;;  %v401_v50 = vcombine.low %v323_v38, %v327_v39  ;;  %v402_v51 = vcombine.low %v331_v42, %v335_v43 }
  0xc4   : > { %v392_v52 = vrot.slane %v384_v44, %v1034_v22  ;;  %v403_v53 = vcombine.low %v339_v45, %v343_v46  ;;  %v486_v19 = vstv %s485_s12  ;;  %vm488_vm3 = vcmp.ne.f32.partialorder %v269_v17, 0.0 }
  0xc5   : > { %v399_v54 = vrot.slane %v385_v48, %v1034_v22  ;;  %v404_v55 = vcombine.low %v347_v47, %v351_v49  ;;  %v411_v56 = vrot.slane %v401_v50, %v1034_v22  ;;  %v418_v57 = vrot.slane %v402_v51, %v1034_v22 }
  0xc6   : > { %v425_v58 = vrot.slane %v403_v53, %v1034_v22  ;;  %v513_v41 = vld [vmem:[#allocation3] sm:$0x1] }
  0xc7   : > { %v400_v59 = vcombine.low %v392_v52, %v399_v54  ;;  %v432_v60 = vrot.slane %v404_v55, %v1034_v22  ;;  %v433_v61 = vcombine.low %v411_v56, %v418_v57  ;;  %v520_v55 = vld [vmem:[#allocation4] sm:$0x1] }
  0xc9   : > { %451 = vperm.xlu1 %763, %v400_v59   ;;  %v434_v62 = vcombine.low %v425_v58, %v432_v60  ;;  %v441_v63 = vrot.slane %v433_v61, %v1034_v22 }
  0xcb   : > { %v448_v1 = vrot.slane %v434_v62, %v1034_v22 }
  0xcd   : > { %v449_v3 = vcombine.low %v441_v63, %v448_v1 }
  0xcf   : > { %454 = vperm.xlu1 %763, %v449_v3  }
 0x144   : > { %v452_v7 = vpop.permute.xlu1 %451 }
 0x145   : > { %v461_v14 = vrot.slane %v452_v7, %v460_v9 }
 0x14a   : > { %v455_v12 = vpop.permute.xlu1 %454 }
 0x14b   : > { %v466_v15 = vrot.slane %v455_v12, %v465_v10 }
 0x14d   : > { %v468_v16 = vsel %vm467_vm2, %v466_v15, %v461_v14 }
 0x14e   : > { %v475_v8 = vrot.slane %v468_v16, %v1034_v22 }
 0x150   : > { %v482_v18 = vrot.slane %v475_v8, %v1034_v22 }
 0x152   : > { %v484_v20 = vmul.f32 %v482_v18, %v269_v17 }
 0x154   : > { %v487_v11 = vadd.f32 %v486_v19, %v484_v20 }
 0x156   : > { %v489_v21 = vsel %vm488_vm3, %v487_v11, -inf }
 0x157   : > { %v492_v23 = vsel %vm491_vm4, %v489_v21, -inf }
 0x158   : > { %493 = vmax.xlane.f32.xlu0 %v492_v23 }
 0x1e1   : > { %v494_v26 = vpop.xlane.xlu0 %493 }
 0x1e2   : > { %v495_v27 = vmax.f32 %v490_v25, %v494_v26 }
 0x1e4   : > { %v496_v28 = vsub.f32 %v490_v25, %v495_v27  ;;  %512 = vst.msk [vmem:[#allocation2] sm:$0x1] %vm262_vm1, %v495_v27  ;;  %501 = vperm.xlu1 %763, %v495_v27  }
 0x1e6   : > { %v497_v32 = vmul.f32 1.442695, %v496_v28 }
 0x25f   : > { %v502_v22 = vpop.permute.xlu1 %501 }
 0x260   : > { %v507_v29 = vrot.slane %v502_v22, %v1024_v13 }
 0x262   : > { %v508_v30 = vsub.f32 %v489_v21, %v507_v29 }
 0x264   : > { %v509_v31 = vmul.f32 1.442695, %v508_v30 }
 0x266   : > { %765 = vpow2.f32 %v509_v31 }
 0x267   : > { %767 = vpow2.f32 %v497_v32 }
 0x273   : > { %v766_v33 = vpop.eup %765 }
 0x274   : > { %v515_v34 = vsel %vm491_vm4, %v766_v33, 0.0  ;;  %v534_v35 = vrot.slane %v766_v33, %v1024_v13  ;;  %v768_v36 = vpop.eup %767 }
 0x275   : > { %516 = vadd.xlane.f32.xlu0 %v515_v34  ;;  %v514_v42 = vmul.f32 %v768_v36, %v513_v41 }
 0x276   : > { %536 = vbcast.lane.b32.xlu1 %v534_v35, 256 }
 0x27a   : > { %523 = vperm.xlu1 %763, %v768_v36  }
 0x28b   : > { %549 = vbcast.lane.b32.xlu0 %v534_v35, 264 }
 0x2e8   : > { %v537_v37 = vpop.permute.xlu1 %536 }
 0x2e9   : > { %v538_v38 = vmul.f32 %v537_v37, %v1009_v0 }
 0x2eb   : > { %v539_v39 = vsel %vm279_vm0, %v538_v38, 0.0 }
 0x2ec   : > { %v540_v40 = vrot.slane %v539_v39, 4 }
 0x2ee   : > { %v541_v43 = vadd.f32 %v540_v40, %v539_v39 }
 0x2f0   : > { %v542_v46 = vrot.slane %v541_v43, 2 }
 0x2f2   : > { %v543_v51 = vadd.f32 %v542_v46, %v541_v43 }
 0x2f4   : > { %v544_v56 = vrot.slane %v543_v51, 1 }
 0x2f5   : > { %v524_v49 = vpop.permute.xlu1 %523 }
 0x2f6   : > { %v529_v0 = vrot.slane %v524_v49, %v1024_v13  ;;  %v545_v60 = vadd.f32 %v544_v56, %v543_v51 }
 0x2f8   : > { %v530_v58 = vmul.f32 %v529_v0, %v520_v55 }
 0x2fe   : > { %v517_v44 = vpop.xlane.xlu0 %516 }
 0x2ff   : > { %v518_v45 = vadd.f32 %v517_v44, %v514_v42 }
 0x301   : > { %519 = vst.msk [vmem:[#allocation3] sm:$0x1] %vm262_vm1, %v518_v45 }
 0x302   : > { %v550_v47 = vpop.permute.xlu0 %549 }
 0x303   : > { %v551_v48 = vmul.f32 %v550_v47, %v1014_v2  ;;  %v546_v2 = vadd.f32 %v545_v60, %v530_v58 }
 0x305   : > { %v552_v50 = vsel %vm279_vm0, %v551_v48, 0.0 }
 0x306   : > { %v553_v52 = vrot.slane %v552_v50, 4 }
 0x308   : > { %v554_v53 = vadd.f32 %v553_v52, %v552_v50  ;;  %v566_v54 = vld [vmem:[#allocation3] sm:$0x1] }
 0x309   : > { %569 = vperm.xlu1 %763, %v566_v54  }
 0x30a   : > { %v555_v57 = vrot.slane %v554_v53, 2 }
 0x30c   : > { %v556_v59 = vadd.f32 %v555_v57, %v554_v53 }
 0x30e   : > { %v557_v61 = vrot.slane %v556_v59, 1 }
 0x310   : > { %v558_v62 = vadd.f32 %v557_v61, %v556_v59 }
 0x312   : > { %v559_v63 = vadd.f32 %v558_v62, %v546_v2 }
 0x314   : > { %561 = vst.msk [vmem:[#allocation4] sm:$0x1] %vm265_vm5, %v559_v63 }
 0x31b   : > { %v565_v5 = vld [vmem:[#allocation4] sm:$0x1] }
 0x384   : > { %v570_v1 = vpop.permute.xlu1 %569 }
 0x385   : > { %v575_v3 = vrot.slane %v570_v1, %v1024_v13 }
 0x387   : > { %769 = vrcp.f32 %v575_v3 }
 0x394   : > { %v770_v4 = vpop.eup %769 }
 0x395   : > { %v577_v6 = vmul.f32 %v770_v4, %v565_v5 }
 0x397   : > { %578 = vst.msk [vmem:[%s250_s3] sm:$0x1] %vm265_vm5, %v577_v6 }
 0x398   : > { %812 = shalt.err (!%p809_p7)
}
 0x399   : > { %s813_s11 = scalar_lea.hbm %s590_s27, 16  ;;  %s817_s12 = scalar_lea.hbm %s1122_s4, 32 }
 0x39a   : > { %p814_p10 = scmp.ne.s32.totalorder %s590_s27, %s813_s11  ;;  %p818_p2 = scmp.lt.s32.totalorder %s590_s27, %s1122_s4 }
 0x39b   : > { %p819_p8 = scmp.lt.s32.totalorder %s817_s12, %s813_s11 }
 0x39c   : > { %p815_p4 = pnand %p814_p10, %p968_p9 }
 0x39d   : > { %p820_p12 = por %p819_p8, %p818_p2 }
 0x39e   : > { %p816_p13 = pneg %p815_p4 }
 0x3a0   : > { %p821_p0 = pnand %p820_p12, %p816_p13 }
 0x3a2   : > { %824 = shalt.err (!%p821_p0)
}
 0x3a3   : > { %697 = dma.vmem_to_hbm [thread:$0]  (%p968_p9), %s593_s23, 16, %s590_s27, %s580_s7  }
 0x3a4 PF: > { %s604_s15 = sand.u32 1, %s859_s17   ;;  %p1128_p1 = scmp.ge.s32.totalorder %s879_s22, 2 }
 0x3a5   : > { %s605_s16 = scalar_lea.sflag [#allocation8], %s604_s15 }
 0x3a6   : > { %p704_p3 = pnand %p1128_p1, %p975_p11 }
 0x3a8   : > { %p705_p5 = pneg %p704_p3 }
 0x3aa   : > { %854 = dma.done.wait (%p705_p5), %s605_s16, 16  }
 0x3ab   : > { %856 = vsyncadd (%p705_p5), %s605_s16, 4294967280  ;;  %s21_s22 = sadd.s32 1, %s879_s22   ;;  %s1129_s17 = smov %s863_s18 }
 0x3ac   : > { %p18_p6 = scmp.ge.s32.totalorder %s21_s22, 4   ;;  %s1130_s18 = smov %s867_s19 }
 0x3ad   : > { %s1131_s19 = smov %s973_s30  ;;  %s1132_s20 = smov %s875_s21 }
 0x3ae   : > { %s1133_s21 = smov %s1135_s24  ;;  %20 = sbr.rel (!%p18_p6) target bundleno = 8 (0x8), region = 92 }
 0x3b3   :  { %609 = vsyncpa [#allocation7], 1 }
 0x3b4   :  { %611 = vsyncpa [#allocation7 + $0x1], 1 }
 0x3b5   :  { %612 = vsyncpa [#allocation8], 1 }
 0x3b6   :  { %614 = vsyncpa [#allocation8 + $0x1], 1 }

</bundles_post_ra>
